<compile_context>
chip_gen: v7x
topology: tpu7x:2x2x1
jax: 0.10.0
libtpu: 0.0.40
codegen_flags: <defaults>
</compile_context>

<pallas_src>
import functools

import jax
import jax.numpy as jnp
from jax.experimental import pallas as pl
from jax.experimental.pallas import tpu as pltpu

FEATURE_SIZE = 169
HIDDEN_SIZE = 32
OUTPUT_SIZE = 10
F_PAD = 256    # zero-padded contraction dim (lane-aligned K for hoisted matmul)
OUT_PAD = 128  # lane-dense padded width of the final projection
UNROLL_T = 32  # static-unroll threshold for the time loop


def _cell_step(gates, c, batch, hidden):
    """One LSTM cell update from pre-activations `gates` (B, 4H)."""
    H = hidden
    if batch <= 8:
        # Whole-tile activations: at small B the (B, 4H) tile is <= 1 f32 vreg,
        # so two whole-tile EUP passes are as cheap as sliced ones.
        sig = jax.nn.sigmoid(gates)
        th = jnp.tanh(gates)
        i_g = sig[:, 0 * H:1 * H]
        f_g = sig[:, 1 * H:2 * H]
        g_g = th[:, 2 * H:3 * H]
        o_g = sig[:, 3 * H:4 * H]
    else:
        # Larger B: only run the EUP on the lanes that need each activation.
        i_g = jax.nn.sigmoid(gates[:, 0 * H:1 * H])
        f_g = jax.nn.sigmoid(gates[:, 1 * H:2 * H])
        g_g = jnp.tanh(gates[:, 2 * H:3 * H])
        o_g = jax.nn.sigmoid(gates[:, 3 * H:4 * H])
    c_new = f_g * c + i_g * g_g
    h_new = o_g * jnp.tanh(c_new)
    return h_new, c_new


def lstm_kernel(x2d_ref, w_ih_ref, w_hh_ref, b_ref, w_out_ref, b_out_ref,
                out_ref, *, batch, seq_len):
    """Single-invocation LSTM + final linear. All operands resident in VMEM.

    x2d_ref is TIME-MAJOR: row t*B + b holds x[b, t, :] (zero-padded to F_PAD).
    """
    B, T, H = batch, seq_len, HIDDEN_SIZE

    # Hoisted, time-independent input projection for every (t, b) pair:
    # one (T*B, F_PAD) x (F_PAD, 4H) matmul with the combined bias folded in.
    gx = (jnp.dot(x2d_ref[...], w_ih_ref[...],
                  preferred_element_type=jnp.float32)
          + b_ref[...])                                    # (T*B, 4H)

    w_hh = w_hh_ref[...]                                   # (H, 4H)

    h = jnp.zeros((B, H), jnp.float32)
    c = jnp.zeros((B, H), jnp.float32)

    if T <= UNROLL_T:
        # Fully unrolled static loop; every per-step slice is a contiguous
        # static slab (time-major layout), no cross-sublane gathers.
        for t in range(T):
            gx_t = gx[t * B:(t + 1) * B, :]                # (B, 4H) contiguous
            gates = gx_t + jnp.dot(h, w_hh,
                                   preferred_element_type=jnp.float32)
            h, c = _cell_step(gates, c, B, H)
    else:
        # Long sequences: bound vreg live ranges / code size with fori_loop.
        gx3 = gx.reshape(T, B, 4 * H)

        def body(t, carry):
            h_t, c_t = carry
            gates = gx3[t] + jnp.dot(h_t, w_hh,
                                     preferred_element_type=jnp.float32)
            return _cell_step(gates, c_t, B, H)

        h, c = jax.lax.fori_loop(0, T, body, (h, c), unroll=4)

    # Final linear on the last hidden state; 128-lane (unmasked) store.
    out_ref[...] = (jnp.dot(h, w_out_ref[...],
                            preferred_element_type=jnp.float32)
                    + b_out_ref[...])


def lstm_forward(x, params):
    """x: (B, T, F) float32 -> (B, OUTPUT_SIZE) float32."""
    B, T, F = x.shape
    H, O = HIDDEN_SIZE, OUTPUT_SIZE

    w_ih = params["w_ih"]      # (F, 4H)
    w_hh = params["w_hh"]      # (H, 4H)
    b = params["b"]            # (1, 4H) == b_ih + b_hh
    w_out = params["w_out"]    # (H, O)
    b_out = params["b_out"]    # (1, O)

    # Zero-pad the contraction dim F -> F_PAD once (aligned, unmasked loads;
    # zeros contribute nothing to the matmul).
    w_ih_p = jnp.zeros((F_PAD, 4 * H), jnp.float32).at[:F, :].set(w_ih)

    # Lane-dense final projection: zero-pad the O outputs up to 128 lanes.
    w_out_p = jnp.zeros((H, OUT_PAD), jnp.float32).at[:, :O].set(w_out)
    b_out_p = jnp.zeros((1, OUT_PAD), jnp.float32).at[:, :O].set(b_out)

    # Time-major input: (B,T,F) -> (T,B,F) -> flatten -> zero-pad F to F_PAD.
    # Small (~tens of KB) and fused by XLA; makes every in-kernel per-step
    # slice contiguous.
    x_tm = jnp.transpose(x, (1, 0, 2)).reshape(T * B, F)
    x2d = jnp.zeros((T * B, F_PAD), jnp.float32).at[:, :F].set(x_tm)

    # Advisory cost for XLA scheduling around this latency-bound call.
    flops = (2 * (T * B) * F_PAD * 4 * H          # hoisted input projection
             + T * 2 * B * H * 4 * H              # recurrent matmul per step
             + 2 * B * H * OUT_PAD)               # final linear
    trans_per_step = B * (9 * H) if B <= 8 else B * (5 * H)
    transcendentals = T * trans_per_step
    bytes_accessed = 4 * (T * B * F_PAD + F_PAD * 4 * H + H * 4 * H + 4 * H
                          + H * OUT_PAD + OUT_PAD + B * OUT_PAD)

    vmem_spec = lambda: pl.BlockSpec(memory_space=pltpu.MemorySpace.VMEM)

    kernel = functools.partial(lstm_kernel, batch=B, seq_len=T)
    out_p = pl.pallas_call(
        kernel,
        out_shape=jax.ShapeDtypeStruct((B, OUT_PAD), jnp.float32),
        in_specs=[vmem_spec() for _ in range(6)],
        out_specs=vmem_spec(),
        cost_estimate=pl.CostEstimate(flops=flops,
                                      transcendentals=transcendentals,
                                      bytes_accessed=bytes_accessed),
    )(x2d, w_ih_p, w_hh, b, w_out_p, b_out_p)

    return out_p[:, :O]


def make_params(key):
    """Deterministic synthetic params matching the PyTorch module's shapes.
    LSTM params ~ N(0, 0.001) as in the module; linear init is synthetic."""
    k1, k2, k3, k4, k5, k6 = jax.random.split(key, 6)
    F, H, O = FEATURE_SIZE, HIDDEN_SIZE, OUTPUT_SIZE
    std = 0.001
    # PyTorch stores weight_ih_l0 as (4H, F); we keep the transposed (F, 4H)
    # layout so the kernel does x @ w_ih directly (same gate order i,f,g,o).
    w_ih = jax.random.normal(k1, (F, 4 * H), jnp.float32) * std
    w_hh = jax.random.normal(k2, (H, 4 * H), jnp.float32) * std
    b_ih = jax.random.normal(k3, (4 * H,), jnp.float32) * std
    b_hh = jax.random.normal(k4, (4 * H,), jnp.float32) * std
    bound = 1.0 / jnp.sqrt(jnp.float32(H))
    w_out = jax.random.uniform(k5, (H, O), jnp.float32, -bound, bound)
    b_out = jax.random.uniform(k6, (1, O), jnp.float32, -bound, bound)
    return {
        "w_ih": w_ih,
        "w_hh": w_hh,
        "b": (b_ih + b_hh).reshape(1, 4 * H),
        "w_out": w_out,
        "b_out": b_out,
    }


def lstm_reference(x, params):
    """Pure-JAX reference (PyTorch LSTM gate order i,f,g,o)."""
    B, T, F = x.shape
    H = HIDDEN_SIZE
    w_ih, w_hh, b = params["w_ih"], params["w_hh"], params["b"]

    def step(carry, x_t):
        h, c = carry
        gates = x_t @ w_ih + h @ w_hh + b
        i = jax.nn.sigmoid(gates[:, 0 * H:1 * H])
        f = jax.nn.sigmoid(gates[:, 1 * H:2 * H])
        g = jnp.tanh(gates[:, 2 * H:3 * H])
        o = jax.nn.sigmoid(gates[:, 3 * H:4 * H])
        c = f * c + i * g
        h = o * jnp.tanh(c)
        return (h, c), None

    h0 = jnp.zeros((B, H), jnp.float32)
    c0 = jnp.zeros((B, H), jnp.float32)
    (h_last, _), _ = jax.lax.scan(step, (h0, c0), jnp.transpose(x, (1, 0, 2)))
    return h_last @ params["w_out"] + params["b_out"]


if __name__ == "__main__":
    B, T, F = 2, 8, FEATURE_SIZE
    key = jax.random.PRNGKey(0)
    kx, kp = jax.random.split(key)
    x = jax.random.normal(kx, (B, T, F), jnp.float32)
    params = make_params(kp)

    lstm_fn = jax.jit(lstm_forward)
    out = jax.block_until_ready(lstm_fn(x, params))
    ref = lstm_reference(x, params)

    assert out.shape == (B, OUTPUT_SIZE)
    assert jnp.allclose(out, ref, atol=1e-5, rtol=1e-5)
    print("KERNEL_OK")
</pallas_src>

<mosaic_0001>
module attributes {stable_mosaic.version = 11 : i64} {
  func.func @lstm_kernel(%arg0: memref<16x256xf32, #tpu.memory_space<vmem>>, %arg1: memref<256x128xf32, #tpu.memory_space<vmem>>, %arg2: memref<32x128xf32, #tpu.memory_space<vmem>>, %arg3: memref<1x128xf32, #tpu.memory_space<vmem>>, %arg4: memref<32x128xf32, #tpu.memory_space<vmem>>, %arg5: memref<1x128xf32, #tpu.memory_space<vmem>>, %arg6: memref<2x128xf32, #tpu.memory_space<vmem>>) attributes {dimension_semantics = [], scalar_prefetch = 0 : i64, scratch_operands = 0 : i64, tpu.core_type = #tpu.core_type<tc>} {
    %c0 = arith.constant 0 : index
    %c0_0 = arith.constant 0 : index
    %0 = vector.load %arg0[%c0, %c0_0] : memref<16x256xf32, #tpu.memory_space<vmem>>, vector<16x256xf32>
    %c0_1 = arith.constant 0 : index
    %c0_2 = arith.constant 0 : index
    %1 = vector.load %arg1[%c0_1, %c0_2] : memref<256x128xf32, #tpu.memory_space<vmem>>, vector<256x128xf32>
    %cst = arith.constant dense<0.000000e+00> : vector<16x128xf32>
    %2 = tpu.matmul %0, %1, %cst {dimension_numbers = #tpu.dot_dimension_numbers<[1], [0], [0], [1], [0, 0, 1, 1], [], []>} : vector<16x256xf32>, vector<256x128xf32>, vector<16x128xf32> -> vector<16x128xf32>
    %c0_3 = arith.constant 0 : index
    %c0_4 = arith.constant 0 : index
    %3 = vector.load %arg3[%c0_3, %c0_4] : memref<1x128xf32, #tpu.memory_space<vmem>>, vector<1x128xf32>
    %4 = vector.broadcast %3 : vector<1x128xf32> to vector<16x128xf32>
    %5 = arith.addf %2, %4 : vector<16x128xf32>
    %c0_5 = arith.constant 0 : index
    %c0_6 = arith.constant 0 : index
    %6 = vector.load %arg2[%c0_5, %c0_6] : memref<32x128xf32, #tpu.memory_space<vmem>>, vector<32x128xf32>
    %cst_7 = arith.constant 0.000000e+00 : f32
    %7 = vector.broadcast %cst_7 : f32 to vector<2x32xf32>
    %cst_8 = arith.constant 0.000000e+00 : f32
    %8 = vector.broadcast %cst_8 : f32 to vector<2x32xf32>
    %9 = vector.extract_strided_slice %5 {offsets = [0, 0], sizes = [2, 128], strides = [1, 1]} : vector<16x128xf32> to vector<2x128xf32>
    %cst_9 = arith.constant dense<0.000000e+00> : vector<2x128xf32>
    %10 = tpu.matmul %7, %6, %cst_9 {dimension_numbers = #tpu.dot_dimension_numbers<[1], [0], [0], [1], [0, 0, 1, 1], [], []>} : vector<2x32xf32>, vector<32x128xf32>, vector<2x128xf32> -> vector<2x128xf32>
    %11 = arith.addf %9, %10 : vector<2x128xf32>
    %12 = arith.negf %11 : vector<2x128xf32>
    %13 = math.exp %12 : vector<2x128xf32>
    %cst_10 = arith.constant 1.000000e+00 : f32
    %14 = vector.broadcast %cst_10 : f32 to vector<2x128xf32>
    %15 = arith.addf %14, %13 : vector<2x128xf32>
    %16 = arith.divf %14, %15 : vector<2x128xf32>
    %17 = math.tanh %11 : vector<2x128xf32>
    %18 = vector.extract_strided_slice %16 {offsets = [0, 0], sizes = [2, 32], strides = [1, 1]} : vector<2x128xf32> to vector<2x32xf32>
    %19 = vector.extract_strided_slice %16 {offsets = [0, 32], sizes = [2, 32], strides = [1, 1]} : vector<2x128xf32> to vector<2x32xf32>
    %20 = vector.extract_strided_slice %17 {offsets = [0, 64], sizes = [2, 32], strides = [1, 1]} : vector<2x128xf32> to vector<2x32xf32>
    %21 = vector.extract_strided_slice %16 {offsets = [0, 96], sizes = [2, 32], strides = [1, 1]} : vector<2x128xf32> to vector<2x32xf32>
    %22 = arith.mulf %19, %8 : vector<2x32xf32>
    %23 = arith.mulf %18, %20 : vector<2x32xf32>
    %24 = arith.addf %22, %23 : vector<2x32xf32>
    %25 = math.tanh %24 : vector<2x32xf32>
    %26 = arith.mulf %21, %25 : vector<2x32xf32>
    %27 = vector.extract_strided_slice %5 {offsets = [2, 0], sizes = [2, 128], strides = [1, 1]} : vector<16x128xf32> to vector<2x128xf32>
    %cst_11 = arith.constant dense<0.000000e+00> : vector<2x128xf32>
    %28 = tpu.matmul %26, %6, %cst_11 {dimension_numbers = #tpu.dot_dimension_numbers<[1], [0], [0], [1], [0, 0, 1, 1], [], []>} : vector<2x32xf32>, vector<32x128xf32>, vector<2x128xf32> -> vector<2x128xf32>
    %29 = arith.addf %27, %28 : vector<2x128xf32>
    %30 = arith.negf %29 : vector<2x128xf32>
    %31 = math.exp %30 : vector<2x128xf32>
    %cst_12 = arith.constant 1.000000e+00 : f32
    %32 = vector.broadcast %cst_12 : f32 to vector<2x128xf32>
    %33 = arith.addf %32, %31 : vector<2x128xf32>
    %34 = arith.divf %32, %33 : vector<2x128xf32>
    %35 = math.tanh %29 : vector<2x128xf32>
    %36 = vector.extract_strided_slice %34 {offsets = [0, 0], sizes = [2, 32], strides = [1, 1]} : vector<2x128xf32> to vector<2x32xf32>
    %37 = vector.extract_strided_slice %34 {offsets = [0, 32], sizes = [2, 32], strides = [1, 1]} : vector<2x128xf32> to vector<2x32xf32>
    %38 = vector.extract_strided_slice %35 {offsets = [0, 64], sizes = [2, 32], strides = [1, 1]} : vector<2x128xf32> to vector<2x32xf32>
    %39 = vector.extract_strided_slice %34 {offsets = [0, 96], sizes = [2, 32], strides = [1, 1]} : vector<2x128xf32> to vector<2x32xf32>
    %40 = arith.mulf %37, %24 : vector<2x32xf32>
    %41 = arith.mulf %36, %38 : vector<2x32xf32>
    %42 = arith.addf %40, %41 : vector<2x32xf32>
    %43 = math.tanh %42 : vector<2x32xf32>
    %44 = arith.mulf %39, %43 : vector<2x32xf32>
    %45 = vector.extract_strided_slice %5 {offsets = [4, 0], sizes = [2, 128], strides = [1, 1]} : vector<16x128xf32> to vector<2x128xf32>
    %cst_13 = arith.constant dense<0.000000e+00> : vector<2x128xf32>
    %46 = tpu.matmul %44, %6, %cst_13 {dimension_numbers = #tpu.dot_dimension_numbers<[1], [0], [0], [1], [0, 0, 1, 1], [], []>} : vector<2x32xf32>, vector<32x128xf32>, vector<2x128xf32> -> vector<2x128xf32>
    %47 = arith.addf %45, %46 : vector<2x128xf32>
    %48 = arith.negf %47 : vector<2x128xf32>
    %49 = math.exp %48 : vector<2x128xf32>
    %cst_14 = arith.constant 1.000000e+00 : f32
    %50 = vector.broadcast %cst_14 : f32 to vector<2x128xf32>
    %51 = arith.addf %50, %49 : vector<2x128xf32>
    %52 = arith.divf %50, %51 : vector<2x128xf32>
    %53 = math.tanh %47 : vector<2x128xf32>
    %54 = vector.extract_strided_slice %52 {offsets = [0, 0], sizes = [2, 32], strides = [1, 1]} : vector<2x128xf32> to vector<2x32xf32>
    %55 = vector.extract_strided_slice %52 {offsets = [0, 32], sizes = [2, 32], strides = [1, 1]} : vector<2x128xf32> to vector<2x32xf32>
    %56 = vector.extract_strided_slice %53 {offsets = [0, 64], sizes = [2, 32], strides = [1, 1]} : vector<2x128xf32> to vector<2x32xf32>
    %57 = vector.extract_strided_slice %52 {offsets = [0, 96], sizes = [2, 32], strides = [1, 1]} : vector<2x128xf32> to vector<2x32xf32>
    %58 = arith.mulf %55, %42 : vector<2x32xf32>
    %59 = arith.mulf %54, %56 : vector<2x32xf32>
    %60 = arith.addf %58, %59 : vector<2x32xf32>
    %61 = math.tanh %60 : vector<2x32xf32>
    %62 = arith.mulf %57, %61 : vector<2x32xf32>
    %63 = vector.extract_strided_slice %5 {offsets = [6, 0], sizes = [2, 128], strides = [1, 1]} : vector<16x128xf32> to vector<2x128xf32>
    %cst_15 = arith.constant dense<0.000000e+00> : vector<2x128xf32>
    %64 = tpu.matmul %62, %6, %cst_15 {dimension_numbers = #tpu.dot_dimension_numbers<[1], [0], [0], [1], [0, 0, 1, 1], [], []>} : vector<2x32xf32>, vector<32x128xf32>, vector<2x128xf32> -> vector<2x128xf32>
    %65 = arith.addf %63, %64 : vector<2x128xf32>
    %66 = arith.negf %65 : vector<2x128xf32>
    %67 = math.exp %66 : vector<2x128xf32>
    %cst_16 = arith.constant 1.000000e+00 : f32
    %68 = vector.broadcast %cst_16 : f32 to vector<2x128xf32>
    %69 = arith.addf %68, %67 : vector<2x128xf32>
    %70 = arith.divf %68, %69 : vector<2x128xf32>
    %71 = math.tanh %65 : vector<2x128xf32>
    %72 = vector.extract_strided_slice %70 {offsets = [0, 0], sizes = [2, 32], strides = [1, 1]} : vector<2x128xf32> to vector<2x32xf32>
    %73 = vector.extract_strided_slice %70 {offsets = [0, 32], sizes = [2, 32], strides = [1, 1]} : vector<2x128xf32> to vector<2x32xf32>
    %74 = vector.extract_strided_slice %71 {offsets = [0, 64], sizes = [2, 32], strides = [1, 1]} : vector<2x128xf32> to vector<2x32xf32>
    %75 = vector.extract_strided_slice %70 {offsets = [0, 96], sizes = [2, 32], strides = [1, 1]} : vector<2x128xf32> to vector<2x32xf32>
    %76 = arith.mulf %73, %60 : vector<2x32xf32>
    %77 = arith.mulf %72, %74 : vector<2x32xf32>
    %78 = arith.addf %76, %77 : vector<2x32xf32>
    %79 = math.tanh %78 : vector<2x32xf32>
    %80 = arith.mulf %75, %79 : vector<2x32xf32>
    %81 = vector.extract_strided_slice %5 {offsets = [8, 0], sizes = [2, 128], strides = [1, 1]} : vector<16x128xf32> to vector<2x128xf32>
    %cst_17 = arith.constant dense<0.000000e+00> : vector<2x128xf32>
    %82 = tpu.matmul %80, %6, %cst_17 {dimension_numbers = #tpu.dot_dimension_numbers<[1], [0], [0], [1], [0, 0, 1, 1], [], []>} : vector<2x32xf32>, vector<32x128xf32>, vector<2x128xf32> -> vector<2x128xf32>
    %83 = arith.addf %81, %82 : vector<2x128xf32>
    %84 = arith.negf %83 : vector<2x128xf32>
    %85 = math.exp %84 : vector<2x128xf32>
    %cst_18 = arith.constant 1.000000e+00 : f32
    %86 = vector.broadcast %cst_18 : f32 to vector<2x128xf32>
    %87 = arith.addf %86, %85 : vector<2x128xf32>
    %88 = arith.divf %86, %87 : vector<2x128xf32>
    %89 = math.tanh %83 : vector<2x128xf32>
    %90 = vector.extract_strided_slice %88 {offsets = [0, 0], sizes = [2, 32], strides = [1, 1]} : vector<2x128xf32> to vector<2x32xf32>
    %91 = vector.extract_strided_slice %88 {offsets = [0, 32], sizes = [2, 32], strides = [1, 1]} : vector<2x128xf32> to vector<2x32xf32>
    %92 = vector.extract_strided_slice %89 {offsets = [0, 64], sizes = [2, 32], strides = [1, 1]} : vector<2x128xf32> to vector<2x32xf32>
    %93 = vector.extract_strided_slice %88 {offsets = [0, 96], sizes = [2, 32], strides = [1, 1]} : vector<2x128xf32> to vector<2x32xf32>
    %94 = arith.mulf %91, %78 : vector<2x32xf32>
    %95 = arith.mulf %90, %92 : vector<2x32xf32>
    %96 = arith.addf %94, %95 : vector<2x32xf32>
    %97 = math.tanh %96 : vector<2x32xf32>
    %98 = arith.mulf %93, %97 : vector<2x32xf32>
    %99 = vector.extract_strided_slice %5 {offsets = [10, 0], sizes = [2, 128], strides = [1, 1]} : vector<16x128xf32> to vector<2x128xf32>
    %cst_19 = arith.constant dense<0.000000e+00> : vector<2x128xf32>
    %100 = tpu.matmul %98, %6, %cst_19 {dimension_numbers = #tpu.dot_dimension_numbers<[1], [0], [0], [1], [0, 0, 1, 1], [], []>} : vector<2x32xf32>, vector<32x128xf32>, vector<2x128xf32> -> vector<2x128xf32>
    %101 = arith.addf %99, %100 : vector<2x128xf32>
    %102 = arith.negf %101 : vector<2x128xf32>
    %103 = math.exp %102 : vector<2x128xf32>
    %cst_20 = arith.constant 1.000000e+00 : f32
    %104 = vector.broadcast %cst_20 : f32 to vector<2x128xf32>
    %105 = arith.addf %104, %103 : vector<2x128xf32>
    %106 = arith.divf %104, %105 : vector<2x128xf32>
    %107 = math.tanh %101 : vector<2x128xf32>
    %108 = vector.extract_strided_slice %106 {offsets = [0, 0], sizes = [2, 32], strides = [1, 1]} : vector<2x128xf32> to vector<2x32xf32>
    %109 = vector.extract_strided_slice %106 {offsets = [0, 32], sizes = [2, 32], strides = [1, 1]} : vector<2x128xf32> to vector<2x32xf32>
    %110 = vector.extract_strided_slice %107 {offsets = [0, 64], sizes = [2, 32], strides = [1, 1]} : vector<2x128xf32> to vector<2x32xf32>
    %111 = vector.extract_strided_slice %106 {offsets = [0, 96], sizes = [2, 32], strides = [1, 1]} : vector<2x128xf32> to vector<2x32xf32>
    %112 = arith.mulf %109, %96 : vector<2x32xf32>
    %113 = arith.mulf %108, %110 : vector<2x32xf32>
    %114 = arith.addf %112, %113 : vector<2x32xf32>
    %115 = math.tanh %114 : vector<2x32xf32>
    %116 = arith.mulf %111, %115 : vector<2x32xf32>
    %117 = vector.extract_strided_slice %5 {offsets = [12, 0], sizes = [2, 128], strides = [1, 1]} : vector<16x128xf32> to vector<2x128xf32>
    %cst_21 = arith.constant dense<0.000000e+00> : vector<2x128xf32>
    %118 = tpu.matmul %116, %6, %cst_21 {dimension_numbers = #tpu.dot_dimension_numbers<[1], [0], [0], [1], [0, 0, 1, 1], [], []>} : vector<2x32xf32>, vector<32x128xf32>, vector<2x128xf32> -> vector<2x128xf32>
    %119 = arith.addf %117, %118 : vector<2x128xf32>
    %120 = arith.negf %119 : vector<2x128xf32>
    %121 = math.exp %120 : vector<2x128xf32>
    %cst_22 = arith.constant 1.000000e+00 : f32
    %122 = vector.broadcast %cst_22 : f32 to vector<2x128xf32>
    %123 = arith.addf %122, %121 : vector<2x128xf32>
    %124 = arith.divf %122, %123 : vector<2x128xf32>
    %125 = math.tanh %119 : vector<2x128xf32>
    %126 = vector.extract_strided_slice %124 {offsets = [0, 0], sizes = [2, 32], strides = [1, 1]} : vector<2x128xf32> to vector<2x32xf32>
    %127 = vector.extract_strided_slice %124 {offsets = [0, 32], sizes = [2, 32], strides = [1, 1]} : vector<2x128xf32> to vector<2x32xf32>
    %128 = vector.extract_strided_slice %125 {offsets = [0, 64], sizes = [2, 32], strides = [1, 1]} : vector<2x128xf32> to vector<2x32xf32>
    %129 = vector.extract_strided_slice %124 {offsets = [0, 96], sizes = [2, 32], strides = [1, 1]} : vector<2x128xf32> to vector<2x32xf32>
    %130 = arith.mulf %127, %114 : vector<2x32xf32>
    %131 = arith.mulf %126, %128 : vector<2x32xf32>
    %132 = arith.addf %130, %131 : vector<2x32xf32>
    %133 = math.tanh %132 : vector<2x32xf32>
    %134 = arith.mulf %129, %133 : vector<2x32xf32>
    %135 = vector.extract_strided_slice %5 {offsets = [14, 0], sizes = [2, 128], strides = [1, 1]} : vector<16x128xf32> to vector<2x128xf32>
    %cst_23 = arith.constant dense<0.000000e+00> : vector<2x128xf32>
    %136 = tpu.matmul %134, %6, %cst_23 {dimension_numbers = #tpu.dot_dimension_numbers<[1], [0], [0], [1], [0, 0, 1, 1], [], []>} : vector<2x32xf32>, vector<32x128xf32>, vector<2x128xf32> -> vector<2x128xf32>
    %137 = arith.addf %135, %136 : vector<2x128xf32>
    %138 = arith.negf %137 : vector<2x128xf32>
    %139 = math.exp %138 : vector<2x128xf32>
    %cst_24 = arith.constant 1.000000e+00 : f32
    %140 = vector.broadcast %cst_24 : f32 to vector<2x128xf32>
    %141 = arith.addf %140, %139 : vector<2x128xf32>
    %142 = arith.divf %140, %141 : vector<2x128xf32>
    %143 = math.tanh %137 : vector<2x128xf32>
    %144 = vector.extract_strided_slice %142 {offsets = [0, 0], sizes = [2, 32], strides = [1, 1]} : vector<2x128xf32> to vector<2x32xf32>
    %145 = vector.extract_strided_slice %142 {offsets = [0, 32], sizes = [2, 32], strides = [1, 1]} : vector<2x128xf32> to vector<2x32xf32>
    %146 = vector.extract_strided_slice %143 {offsets = [0, 64], sizes = [2, 32], strides = [1, 1]} : vector<2x128xf32> to vector<2x32xf32>
    %147 = vector.extract_strided_slice %142 {offsets = [0, 96], sizes = [2, 32], strides = [1, 1]} : vector<2x128xf32> to vector<2x32xf32>
    %148 = arith.mulf %145, %132 : vector<2x32xf32>
    %149 = arith.mulf %144, %146 : vector<2x32xf32>
    %150 = arith.addf %148, %149 : vector<2x32xf32>
    %151 = math.tanh %150 : vector<2x32xf32>
    %152 = arith.mulf %147, %151 : vector<2x32xf32>
    %c0_25 = arith.constant 0 : index
    %c0_26 = arith.constant 0 : index
    %153 = vector.load %arg4[%c0_25, %c0_26] : memref<32x128xf32, #tpu.memory_space<vmem>>, vector<32x128xf32>
    %cst_27 = arith.constant dense<0.000000e+00> : vector<2x128xf32>
    %154 = tpu.matmul %152, %153, %cst_27 {dimension_numbers = #tpu.dot_dimension_numbers<[1], [0], [0], [1], [0, 0, 1, 1], [], []>} : vector<2x32xf32>, vector<32x128xf32>, vector<2x128xf32> -> vector<2x128xf32>
    %c0_28 = arith.constant 0 : index
    %c0_29 = arith.constant 0 : index
    %155 = vector.load %arg5[%c0_28, %c0_29] : memref<1x128xf32, #tpu.memory_space<vmem>>, vector<1x128xf32>
    %156 = vector.broadcast %155 : vector<1x128xf32> to vector<2x128xf32>
    %157 = arith.addf %154, %156 : vector<2x128xf32>
    %c0_30 = arith.constant 0 : index
    %c0_31 = arith.constant 0 : index
    %158 = vector.load %arg6[%c0_30, %c0_31] : memref<2x128xf32, #tpu.memory_space<vmem>>, vector<2x128xf32>
    tpu.vector_store %arg6[%c0_30, %c0_31], %157 {strides = array<i32>} : memref<2x128xf32, #tpu.memory_space<vmem>>, vector<2x128xf32>,
    return
  }
}

</mosaic_0001>

<bundles_post_ra>
// kernel: lstm_forward.1
= control target key start
LH: loop header
LB: loop body
LE: loop exit
PB: predicated region body
PF: predicated region fallthrough
CT: control target
= control target key end

     0   :  { %v1471_v7 = vmov 0.0|0.0   ;;  %vm1472_vm0 = vmmov 0   ;;  %v1473_v8 = vmov 0.0   ;;  %s1775_s0 = inlined_call_operand.vmem [shape: f32[16,256], index: 0, kind: input, shape index: {}]   ;;  %s1776_s1 = inlined_call_operand.vmem [shape: f32[256,128], index: 1, kind: input, shape index: {}]   ;;  %s1777_s2 = inlined_call_operand.vmem [shape: f32[32,128], index: 2, kind: input, shape index: {}]   ;;  %s1778_s3 = inlined_call_operand.vmem [shape: f32[1,128], index: 3, kind: input, shape index: {}]   ;;  %s1779_s4 = inlined_call_operand.vmem [shape: f32[32,128], index: 4, kind: input, shape index: {}]   ;;  %s1780_s5 = inlined_call_operand.vmem [shape: f32[1,128], index: 5, kind: input, shape index: {}]   ;;  %s1781_s6 = inlined_call_operand.hbm [shape: f32[2,128], index: 6, kind: output, shape index: {}]  }
   0x1   :  { %v44_v0 = vld [vmem:[%s1776_s1 + $0x80] sm:$0xff]  ;;  %v45_v1 = vld [vmem:[%s1776_s1 + $0x88] sm:$0xff]  ;;  %v46_v5 = vld [vmem:[%s1776_s1 + $0x90] sm:$0xff]  ;;  %1323 = vmatprep.subr.bf16.mxu1 %v1471_v7  ;;  %1200 = vmatprep.mubr.msk.f32.mxu1 %vm1472_vm0, %v1473_v8 }
   0x2   :  { %v28_v2 = vld [vmem:[%s1776_s1] sm:$0xff]  ;;  %v1291_v3 = vpack.c.bf16 %v45_v1, %v44_v0  ;;  %v29_v4 = vld [vmem:[%s1776_s1 + $0x8] sm:$0xff]  ;;  %v47_v6 = vld [vmem:[%s1776_s1 + $0x98] sm:$0xff] }
   0x3   :  { %v1293_v9 = vpack.c.bf16 %v29_v4, %v28_v2  ;;  %v1295_v10 = vpack.c.bf16 %v47_v6, %v46_v5  ;;  %v30_v11 = vld [vmem:[%s1776_s1 + $0x10] sm:$0xff]  ;;  %v31_v12 = vld [vmem:[%s1776_s1 + $0x18] sm:$0xff]  ;;  %v48_v13 = vld [vmem:[%s1776_s1 + $0xa0] sm:$0xff] }
   0x4   :  { %1292 = vmatprep.subr.bf16.mxu0 %v1291_v3  ;;  %v49_v14 = vld [vmem:[%s1776_s1 + $0xa8] sm:$0xff]  ;;  %v1297_v15 = vpack.c.bf16 %v31_v12, %v30_v11  ;;  %v32_v17 = vld [vmem:[%s1776_s1 + $0x20] sm:$0xff]  ;;  %v50_v19 = vld [vmem:[%s1776_s1 + $0xb0] sm:$0xff] }
   0x5   :  { %1294 = vmatpush3.bf16.msra.mxu0 %v1293_v9  ;;  %v1299_v16 = vpack.c.bf16 %v49_v14, %v48_v13  ;;  %v33_v18 = vld [vmem:[%s1776_s1 + $0x28] sm:$0xff]  ;;  %v51_v20 = vld [vmem:[%s1776_s1 + $0xb8] sm:$0xff]  ;;  %v34_v23 = vld [vmem:[%s1776_s1 + $0x30] sm:$0xff] }
   0x6   :  { %1296 = vmatprep.subr.bf16.mxu0 %v1295_v10  ;;  %v1301_v21 = vpack.c.bf16 %v33_v18, %v32_v17  ;;  %v1303_v22 = vpack.c.bf16 %v51_v20, %v50_v19  ;;  %v35_v24 = vld [vmem:[%s1776_s1 + $0x38] sm:$0xff]  ;;  %v52_v25 = vld [vmem:[%s1776_s1 + $0xc0] sm:$0xff]  ;;  %v53_v26 = vld [vmem:[%s1776_s1 + $0xc8] sm:$0xff] }
   0x7   :  { %v142_v27 = vld [vmem:[%s1777_s2] sm:$0xff]  ;;  %v143_v28 = vld [vmem:[%s1777_s2 + $0x8] sm:$0xff]  ;;  %v1305_v30 = vpack.c.bf16 %v35_v24, %v34_v23  ;;  %v144_v32 = vld [vmem:[%s1777_s2 + $0x10] sm:$0xff] }
   0x8   :  { %v25_v29 = vld [vmem:[%s1775_s0 + $0x8] sm:$0xff]  ;;  %v1578_v31 = vpack.c.bf16 %v143_v28, %v142_v27  ;;  %v145_v33 = vld [vmem:[%s1777_s2 + $0x18] sm:$0xff] }
   0x9   :  { %1298 = vmatpush3.bf16.msra.mxu0 %v1297_v15  ;;  %131 = vmatprep.mubr.f32.mxu0 %v25_v29 }
   0xa   :  { %1300 = vmatprep.subr.bf16.mxu0 %v1299_v16 }
   0xd   :  { %1302 = vmatpush3.bf16.msra.mxu0 %v1301_v21 }
   0xe   :  { %11 = vsyncpa [#allocation3], 0  ;;  %1304 = vmatprep.subr.bf16.mxu0 %v1303_v22  ;;  %v1307_v34 = vpack.c.bf16 %v53_v26, %v52_v25  ;;  %v36_v35 = vld [vmem:[%s1776_s1 + $0x40] sm:$0xff]  ;;  %v37_v36 = vld [vmem:[%s1776_s1 + $0x48] sm:$0xff]  ;;  %1325 = vmatpush3.bf16.msra.mxu1 %v1578_v31  ;;  %v1599_v39 = vpack.c.bf16 %v145_v33, %v144_v32  ;;  %s1474_s25 = smov 64   ;;  %vm146_vm1 = vcmask 261120  }
   0xf   :  { %v54_v37 = vld [vmem:[%s1776_s1 + $0xd0] sm:$0xff]  ;;  %v55_v38 = vld [vmem:[%s1776_s1 + $0xd8] sm:$0xff]  ;;  %1326 = vmatprep.subr.bf16.mxu1 %v1471_v7  ;;  %v1309_v40 = vpack.c.bf16 %v37_v36, %v36_v35  ;;  %v56_v44 = vld [vmem:[%s1776_s1 + $0xe0] sm:$0xff] }
  0x10   :  { %v1311_v41 = vpack.c.bf16 %v55_v38, %v54_v37  ;;  %v38_v42 = vld [vmem:[%s1776_s1 + $0x50] sm:$0xff]  ;;  %v39_v43 = vld [vmem:[%s1776_s1 + $0x58] sm:$0xff]  ;;  %v57_v45 = vld [vmem:[%s1776_s1 + $0xe8] sm:$0xff] }
  0x11   :  { %1306 = vmatpush3.bf16.msra.mxu0 %v1305_v30  ;;  %v1313_v46 = vpack.c.bf16 %v39_v43, %v38_v42  ;;  %v1315_v47 = vpack.c.bf16 %v57_v45, %v56_v44  ;;  %v40_v48 = vld [vmem:[%s1776_s1 + $0x60] sm:$0xff]  ;;  %v41_v49 = vld [vmem:[%s1776_s1 + $0x68] sm:$0xff]  ;;  %v58_v50 = vld [vmem:[%s1776_s1 + $0xf0] sm:$0xff] }
  0x12   :  { %1308 = vmatprep.subr.bf16.mxu0 %v1307_v34  ;;  %1328 = vmatpush3.bf16.msra.mxu1 %v1599_v39  ;;  %v59_v51 = vld [vmem:[%s1776_s1 + $0xf8] sm:$0xff]  ;;  %v1317_v52 = vpack.c.bf16 %v41_v49, %v40_v48  ;;  %v42_v54 = vld [vmem:[%s1776_s1 + $0x70] sm:$0xff]  ;;  %v24_v57 = vld [vmem:[%s1775_s0] sm:$0xff] }
  0x13   :  { %1329 = vmatprep.subr.bf16.mxu1 %v1471_v7  ;;  %v1319_v53 = vpack.c.bf16 %v59_v51, %v58_v50  ;;  %v43_v55 = vld [vmem:[%s1776_s1 + $0x78] sm:$0xff]  ;;  %v1652_v61 = vld [vmem:[%s1778_s3] ss:$0 sm:$0xff]  ;;  %s1475_s3 = smov 32  }
  0x14   :  { %v1321_v56 = vpack.c.bf16 %v43_v55, %v42_v54 }
  0x15   :  { %1310 = vmatpush3.bf16.msra.mxu0 %v1309_v40  ;;  %1201 = vmatmul.mubr.f32.vlgmr.msra.gmra.mrb[0].mxu1 %v1473_v8 }
  0x16   :  { %1312 = vmatprep.subr.bf16.mxu0 %v1311_v41  ;;  %1331 = vmatpush3.bf16.msra.mxu1 %v1578_v31 }
  0x17   :  { %1211 = vmatprep.mubr.msk.f32.mxu1 %vm1472_vm0, %v1473_v8  ;;  %1332 = vmatprep.subr.bf16.mxu1 %v1471_v7 }
  0x19   :  { %1314 = vmatpush3.bf16.msra.mxu0 %v1313_v46 }
  0x1a   :  { %1316 = vmatprep.subr.bf16.mxu0 %v1315_v47  ;;  %1334 = vmatpush3.bf16.msra.mxu1 %v1599_v39 }
  0x1b   :  { %1335 = vmatprep.subr.bf16.mxu1 %v1471_v7 }
  0x1d   :  { %1318 = vmatpush3.bf16.msra.mxu0 %v1317_v52 }
  0x1e   :  { %1320 = vmatprep.subr.bf16.mxu0 %v1319_v53 }
  0x21   :  { %1322 = vmatpush3.bf16.msra.mxu0 %v1321_v56 }
  0x22   :  { %1347 = vmatprep.subr.bf16.mxu0 %v1471_v7 }
  0x24   :  { %132 = vmatmul.mubr.f32.vlgmr.msra.gmra.mrb[0].mxu0 %v24_v57 }
  0x25   :  { %1349 = vmatpush3.bf16.msra.mxu0 %v1578_v31 }
  0x26   :  { %1350 = vmatprep.subr.bf16.mxu0 %v1471_v7 }
  0x29   :  { %1352 = vmatpush3.bf16.msra.mxu0 %v1599_v39 }
  0x2a   :  { %1359 = vmatprep.subr.bf16.mxu0 %v1471_v7 }
  0xe8   :  { %v216_v58 = vpop.f32.mrb[0].mxu1 }
  0xe9   :  { %v1202_v59 = vpop.f32.mrb[1].mxu1 }
  0xf7   :  { %v1141_v60 = vpop.f32.mrb[0].mxu0 }
  0xf8   :  { %v1142_v62 = vpop.f32.mrb[1].mxu0 }
  0xf9   :  { %v1143_v63 = vadd.f32 %v1142_v62, %v1141_v60 }
  0xfb   :  { %v1655_v0 = vadd.f32 %v1143_v63, %v1652_v61 }
  0xfd   :  { %v220_v1 = vadd.f32 %v216_v58, %v1655_v0 }
  0xff   :  { %1383 = vtanh.f32 %v220_v1  ;;  %v1092_v3 = vmul.f32 -1.442695, %v220_v1 }
 0x101   :  { %1385 = vpow2.f32 %v1092_v3 }
 0x109   :  { %v1384_v2 = vpop.eup %1383 }
 0x10a   :  { %230 = vrot.lane.b32.xlu0 %v1384_v2, %s1474_s25 }
 0x10b   :  { %v1386_v4 = vpop.eup %1385 }
 0x10c   :  { %v224_v5 = vadd.f32 1.0, %v1386_v4 }
 0x10e   :  { %1387 = vrcp.f32 %v224_v5 }
 0x118   :  { %v1388_v6 = vpop.eup %1387 }
 0x119   :  { %v228_v11 = vmul.f32 0.0, %v1388_v6 }
 0x17c   :  { %v231_v9 = vpop.permute.xlu0 %230 }
 0x17d   :  { %v233_v10 = vmul.f32 %v1388_v6, %v231_v9 }
 0x17f   :  { %235 = vrot.lane.b32.xlu0 %v233_v10, %s1475_s3 }
 0x1f1   :  { %v236_v12 = vpop.permute.xlu0 %235 }
 0x1f2   :  { %v238_v13 = vadd.f32 %v236_v12, %v228_v11 }
 0x1f4   :  { %1389 = vtanh.f32 %v238_v13  ;;  %v332_v29 = vrot.slane %v238_v13, 6 }
 0x1fe   :  { %v1390_v14 = vpop.eup %1389 }
 0x1ff   :  { %241 = vrot.lane.b32.xlu1 %v1390_v14, %s1474_s25 }
 0x271   :  { %v242_v15 = vpop.permute.xlu1 %241 }
 0x272   :  { %v244_v16 = vmul.f32 %v1388_v6, %v242_v15  ;;  %v26_v15 = vld [vmem:[%s1775_s0 + $0x10] sm:$0xff] }
 0x274   :  { %246 = vrot.lane.b32.xlu1 %v244_v16, %s1475_s3 }
 0x2e6   :  { %v247_v17 = vpop.permute.xlu1 %246 }
 0x2e7   :  { %1212 = vmatmul.mubr.msk.f32.vlgmr.msra.gmra.mrb[2].mxu1 %vm146_vm1, %v247_v17 }
 0x2e8   :  { %1337 = vmatpush3.bf16.msra.mxu1 %v1578_v31  ;;  %1222 = vmatprep.mubr.msk.f32.mxu1 %vm1472_vm0, %v1473_v8 }
 0x2e9   :  { %1338 = vmatprep.subr.bf16.mxu1 %v1471_v7 }
 0x2ec   :  { %1340 = vmatpush3.bf16.msra.mxu1 %v1599_v39 }
 0x2ed   :  { %1341 = vmatprep.subr.bf16.mxu1 %v1471_v7 }
 0x3ba   :  { %v316_v18 = vpop.f32.mrb[2].mxu1 }
 0x3bb   :  { %v321_v19 = vrot.slane %v316_v18, 6  ;;  %v1213_v20 = vpop.f32.mrb[3].mxu1 }
 0x3bd   :  { %v323_v21 = vadd.f32 %v321_v19, %v1655_v0 }
 0x3bf   :  { %1391 = vtanh.f32 %v323_v21  ;;  %v1094_v23 = vmul.f32 -1.442695, %v323_v21 }
 0x3c1   :  { %1393 = vpow2.f32 %v1094_v23 }
 0x3c9   :  { %v1392_v22 = vpop.eup %1391 }
 0x3ca   :  { %336 = vrot.lane.b32.xlu0 %v1392_v22, %s1474_s25 }
 0x3cb   :  { %v1394_v24 = vpop.eup %1393 }
 0x3cc   :  { %v327_v25 = vadd.f32 1.0, %v1394_v24 }
 0x3ce   :  { %1395 = vrcp.f32 %v327_v25 }
 0x3d8   :  { %v1396_v26 = vpop.eup %1395 }
 0x3d9   :  { %v334_v30 = vmul.f32 %v1396_v26, %v332_v29 }
 0x43c   :  { %v337_v27 = vpop.permute.xlu0 %336 }
 0x43d   :  { %v339_v28 = vmul.f32 %v1396_v26, %v337_v27 }
 0x43f   :  { %341 = vrot.lane.b32.xlu1 %v339_v28, %s1475_s3 }
 0x4b1   :  { %v342_v32 = vpop.permute.xlu1 %341 }
 0x4b2   :  { %v344_v33 = vadd.f32 %v342_v32, %v334_v30 }
 0x4b4   :  { %1397 = vtanh.f32 %v344_v33  ;;  %v439_v51 = vrot.slane %v344_v33, 6 }
 0x4be   :  { %v1398_v34 = vpop.eup %1397 }
 0x4bf   :  { %347 = vrot.lane.b32.xlu0 %v1398_v34, %s1474_s25 }
 0x531   :  { %v348_v35 = vpop.permute.xlu0 %347 }
 0x532   :  { %v350_v36 = vmul.f32 %v1396_v26, %v348_v35 }
 0x534   :  { %v352_v37 = vrot.slane %v350_v36, 2 }
 0x536   :  { %353 = vrot.lane.b32.xlu1 %v352_v37, %s1475_s3 }
 0x5a8   :  { %v354_v38 = vpop.permute.xlu1 %353 }
 0x5a9   :  { %1223 = vmatmul.mubr.msk.f32.vlgmr.msra.gmra.mrb[4].mxu1 %vm146_vm1, %v354_v38 }
 0x5aa   :  { %1343 = vmatpush3.bf16.msra.mxu1 %v1578_v31  ;;  %1233 = vmatprep.mubr.msk.f32.mxu1 %vm1472_vm0, %v1473_v8 }
 0x5ab   :  { %1344 = vmatprep.subr.bf16.mxu1 %v1471_v7 }
 0x5ae   :  { %1346 = vmatpush3.bf16.msra.mxu1 %v1599_v39 }
 0x5af   :  { %1353 = vmatprep.subr.bf16.mxu1 %v1471_v7 }
 0x67c   :  { %v423_v40 = vpop.f32.mrb[4].mxu1 }
 0x67d   :  { %v428_v41 = vrot.slane %v423_v40, 4  ;;  %v1224_v42 = vpop.f32.mrb[5].mxu1 }
 0x67f   :  { %v430_v43 = vadd.f32 %v428_v41, %v1655_v0 }
 0x681   :  { %1399 = vtanh.f32 %v430_v43  ;;  %v1096_v45 = vmul.f32 -1.442695, %v430_v43 }
 0x683   :  { %1401 = vpow2.f32 %v1096_v45 }
 0x68b   :  { %v1400_v44 = vpop.eup %1399 }
 0x68c   :  { %443 = vrot.lane.b32.xlu0 %v1400_v44, %s1474_s25 }
 0x68d   :  { %v1402_v46 = vpop.eup %1401 }
 0x68e   :  { %v434_v47 = vadd.f32 1.0, %v1402_v46 }
 0x690   :  { %1403 = vrcp.f32 %v434_v47 }
 0x69a   :  { %v1404_v48 = vpop.eup %1403 }
 0x69b   :  { %v441_v52 = vmul.f32 %v1404_v48, %v439_v51 }
 0x6fe   :  { %v444_v49 = vpop.permute.xlu0 %443 }
 0x6ff   :  { %v446_v50 = vmul.f32 %v1404_v48, %v444_v49 }
 0x701   :  { %448 = vrot.lane.b32.xlu1 %v446_v50, %s1475_s3 }
 0x773   :  { %v449_v53 = vpop.permute.xlu1 %448 }
 0x774   :  { %v451_v54 = vadd.f32 %v449_v53, %v441_v52 }
 0x776   :  { %1405 = vtanh.f32 %v451_v54  ;;  %v546_v11 = vrot.slane %v451_v54, 6 }
 0x780   :  { %v1406_v55 = vpop.eup %1405 }
 0x781   :  { %454 = vrot.lane.b32.xlu0 %v1406_v55, %s1474_s25 }
 0x7f3   :  { %v455_v56 = vpop.permute.xlu0 %454 }
 0x7f4   :  { %v457_v57 = vmul.f32 %v1404_v48, %v455_v56 }
 0x7f6   :  { %v459_v58 = vrot.slane %v457_v57, 4 }
 0x7f8   :  { %460 = vrot.lane.b32.xlu1 %v459_v58, %s1475_s3 }
 0x86a   :  { %v461_v59 = vpop.permute.xlu1 %460 }
 0x86b   :  { %1234 = vmatmul.mubr.msk.f32.vlgmr.msra.gmra.mrb[6].mxu1 %vm146_vm1, %v461_v59 }
 0x86c   :  { %1355 = vmatpush3.bf16.msra.mxu1 %v1578_v31  ;;  %1255 = vmatprep.mubr.msk.f32.mxu1 %vm1472_vm0, %v1473_v8 }
 0x86d   :  { %1356 = vmatprep.subr.bf16.mxu1 %v1471_v7 }
 0x870   :  { %1358 = vmatpush3.bf16.msra.mxu1 %v1599_v39 }
 0x871   :  { %1365 = vmatprep.subr.bf16.mxu1 %v1471_v7 }
 0x93e   :  { %v530_v60 = vpop.f32.mrb[6].mxu1 }
 0x93f   :  { %v535_v62 = vrot.slane %v530_v60, 2  ;;  %v1235_v63 = vpop.f32.mrb[7].mxu1 }
 0x941   :  { %v537_v1 = vadd.f32 %v535_v62, %v1655_v0  ;;  %v27_v0 = vld [vmem:[%s1775_s0 + $0x18] sm:$0xff] }
 0x942   :  { %136 = vmatprep.mubr.f32.mxu0 %v27_v0 }
 0x943   :  { %1407 = vtanh.f32 %v537_v1  ;;  %v1098_v3 = vmul.f32 -1.442695, %v537_v1  ;;  %137 = vmatmul.mubr.f32.gmra.mrb[2].mxu0 %v26_v15 }
 0x944   :  { %1244 = vmatprep.mubr.msk.f32.mxu0 %vm1472_vm0, %v1473_v8 }
 0x945   :  { %1409 = vpow2.f32 %v1098_v3 }
 0x94d   :  { %v1408_v2 = vpop.eup %1407 }
 0x94e   :  { %550 = vrot.lane.b32.xlu0 %v1408_v2, %s1474_s25 }
 0x94f   :  { %v1410_v4 = vpop.eup %1409 }
 0x950   :  { %v541_v5 = vadd.f32 1.0, %v1410_v4 }
 0x952   :  { %1411 = vrcp.f32 %v541_v5 }
 0x95c   :  { %v1412_v6 = vpop.eup %1411 }
 0x95d   :  { %v548_v12 = vmul.f32 %v1412_v6, %v546_v11 }
 0x9c0   :  { %v551_v9 = vpop.permute.xlu0 %550 }
 0x9c1   :  { %v553_v10 = vmul.f32 %v1412_v6, %v551_v9 }
 0x9c3   :  { %555 = vrot.lane.b32.xlu1 %v553_v10, %s1475_s3 }
 0xa16   :  { %v1144_v20 = vpop.f32.mrb[2].mxu0 }
 0xa17   :  { %v1145_v21 = vpop.f32.mrb[3].mxu0 }
 0xa18   :  { %v1146_v22 = vadd.f32 %v1145_v21, %v1144_v20 }
 0xa1a   :  { %v1714_v24 = vadd.f32 %v1146_v22, %v1652_v61 }
 0xa35   :  { %v556_v13 = vpop.permute.xlu1 %555 }
 0xa36   :  { %v558_v14 = vadd.f32 %v556_v13, %v548_v12 }
 0xa38   :  { %1413 = vtanh.f32 %v558_v14  ;;  %v650_v61 = vrot.slane %v558_v14, 6 }
 0xa42   :  { %v1414_v16 = vpop.eup %1413 }
 0xa43   :  { %561 = vrot.lane.b32.xlu0 %v1414_v16, %s1474_s25 }
 0xab5   :  { %v562_v17 = vpop.permute.xlu0 %561 }
 0xab6   :  { %v564_v18 = vmul.f32 %v1412_v6, %v562_v17 }
 0xab8   :  { %v566_v19 = vrot.slane %v564_v18, 6 }
 0xaba   :  { %567 = vrot.lane.b32.xlu1 %v566_v19, %s1475_s3 }
 0xb2c   :  { %v568_v23 = vpop.permute.xlu1 %567 }
 0xb2d   :  { %1245 = vmatmul.mubr.msk.f32.vlgmr.msra.gmra.mrb[4].mxu0 %vm146_vm1, %v568_v23 }
 0xb2e   :  { %1361 = vmatpush3.bf16.msra.mxu0 %v1578_v31  ;;  %1266 = vmatprep.mubr.msk.f32.mxu0 %vm1472_vm0, %v1473_v8 }
 0xb2f   :  { %1362 = vmatprep.subr.bf16.mxu0 %v1471_v7 }
 0xb32   :  { %1364 = vmatpush3.bf16.msra.mxu0 %v1599_v39 }
 0xb33   :  { %1371 = vmatprep.subr.bf16.mxu0 %v1471_v7 }
 0xc00   :  { %v637_v25 = vpop.f32.mrb[4].mxu0 }
 0xc01   :  { %v641_v26 = vadd.f32 %v637_v25, %v1714_v24  ;;  %v1246_v27 = vpop.f32.mrb[5].mxu0 }
 0xc03   :  { %1415 = vtanh.f32 %v641_v26  ;;  %v1100_v29 = vmul.f32 -1.442695, %v641_v26 }
 0xc05   :  { %1417 = vpow2.f32 %v1100_v29 }
 0xc0d   :  { %v1416_v28 = vpop.eup %1415 }
 0xc0e   :  { %654 = vrot.lane.b32.xlu0 %v1416_v28, %s1474_s25 }
 0xc0f   :  { %v1418_v30 = vpop.eup %1417 }
 0xc10   :  { %v645_v32 = vadd.f32 1.0, %v1418_v30 }
 0xc12   :  { %1419 = vrcp.f32 %v645_v32 }
 0xc1c   :  { %v1420_v33 = vpop.eup %1419 }
 0xc1d   :  { %v652_v36 = vmul.f32 %v1420_v33, %v650_v61 }
 0xc80   :  { %v655_v34 = vpop.permute.xlu0 %654 }
 0xc81   :  { %v657_v35 = vmul.f32 %v1420_v33, %v655_v34 }
 0xc83   :  { %659 = vrot.lane.b32.xlu1 %v657_v35, %s1475_s3 }
 0xcf5   :  { %v660_v37 = vpop.permute.xlu1 %659 }
 0xcf6   :  { %v662_v38 = vadd.f32 %v660_v37, %v652_v36  ;;  %v990_v36 = vld [vmem:[%s1779_s4 + $0x8] sm:$0xff]  ;;  %v991_v37 = vld [vmem:[%s1779_s4 + $0x10] sm:$0xff] }
 0xcf8   :  { %1421 = vtanh.f32 %v662_v38 }
 0xd02   :  { %v1422_v40 = vpop.eup %1421 }
 0xd03   :  { %665 = vrot.lane.b32.xlu0 %v1422_v40, %s1474_s25  ;;  %v992_v40 = vld [vmem:[%s1779_s4 + $0x18] sm:$0xff] }
 0xd75   :  { %v666_v41 = vpop.permute.xlu0 %665 }
 0xd76   :  { %v668_v42 = vmul.f32 %v1420_v33, %v666_v41  ;;  %v1375_v41 = vpack.c.bf16 %v992_v40, %v991_v37 }
 0xd78   :  { %670 = vrot.lane.b32.xlu1 %v668_v42, %s1475_s3 }
 0xdea   :  { %v671_v43 = vpop.permute.xlu1 %670 }
 0xdeb   :  { %1256 = vmatmul.mubr.msk.f32.vlgmr.msra.gmra.mrb[8].mxu1 %vm146_vm1, %v671_v43 }
 0xdec   :  { %1367 = vmatpush3.bf16.msra.mxu1 %v1578_v31  ;;  %1277 = vmatprep.mubr.msk.f32.mxu1 %vm1472_vm0, %v1473_v8 }
 0xded   :  { %1368 = vmatprep.subr.bf16.mxu1 %v1471_v7 }
 0xdf0   :  { %1370 = vmatpush3.bf16.msra.mxu1 %v1599_v39  ;;  %v756_v39 = vrot.slane %v662_v38, 6 }
 0xebe   :  { %v740_v44 = vpop.f32.mrb[8].mxu1 }
 0xebf   :  { %v745_v45 = vrot.slane %v740_v44, 6  ;;  %v1257_v46 = vpop.f32.mrb[9].mxu1 }
 0xec1   :  { %v747_v47 = vadd.f32 %v745_v45, %v1714_v24 }
 0xec3   :  { %1423 = vtanh.f32 %v747_v47  ;;  %v1102_v49 = vmul.f32 -1.442695, %v747_v47  ;;  %v1107_v47 = vld [vmem:[%s1780_s5] ss:$0 sm:$0xff] }
 0xec5   :  { %1425 = vpow2.f32 %v1102_v49 }
 0xecd   :  { %v1424_v48 = vpop.eup %1423 }
 0xece   :  { %760 = vrot.lane.b32.xlu0 %v1424_v48, %s1474_s25 }
 0xecf   :  { %v1426_v50 = vpop.eup %1425 }
 0xed0   :  { %v751_v31 = vadd.f32 1.0, %v1426_v50 }
 0xed2   :  { %1427 = vrcp.f32 %v751_v31 }
 0xedc   :  { %v1428_v51 = vpop.eup %1427 }
 0xedd   :  { %v758_v54 = vmul.f32 %v1428_v51, %v756_v39 }
 0xf40   :  { %v761_v52 = vpop.permute.xlu0 %760 }
 0xf41   :  { %v763_v53 = vmul.f32 %v1428_v51, %v761_v52 }
 0xf43   :  { %765 = vrot.lane.b32.xlu1 %v763_v53, %s1475_s3 }
 0xfb5   :  { %v766_v55 = vpop.permute.xlu1 %765 }
 0xfb6   :  { %v768_v56 = vadd.f32 %v766_v55, %v758_v54 }
 0xfb8   :  { %1429 = vtanh.f32 %v768_v56 }
 0xfc2   :  { %v1430_v57 = vpop.eup %1429 }
 0xfc3   :  { %771 = vrot.lane.b32.xlu0 %v1430_v57, %s1474_s25 }
0x1035   :  { %v772_v58 = vpop.permute.xlu0 %771 }
0x1036   :  { %v774_v59 = vmul.f32 %v1428_v51, %v772_v58 }
0x1038   :  { %v776_v60 = vrot.slane %v774_v59, 2 }
0x103a   :  { %777 = vrot.lane.b32.xlu1 %v776_v60, %s1475_s3 }
0x10ac   :  { %v778_v62 = vpop.permute.xlu1 %777 }
0x10ad   :  { %1267 = vmatmul.mubr.msk.f32.vlgmr.msra.gmra.mrb[6].mxu0 %vm146_vm1, %v778_v62 }
0x10ae   :  { %1288 = vmatprep.mubr.msk.f32.mxu0 %vm1472_vm0, %v1473_v8  ;;  %v863_v8 = vrot.slane %v768_v56, 6 }
0x1180   :  { %v847_v63 = vpop.f32.mrb[6].mxu0 }
0x1181   :  { %v852_v1 = vrot.slane %v847_v63, 4  ;;  %v1268_v2 = vpop.f32.mrb[7].mxu0 }
0x1183   :  { %v854_v3 = vadd.f32 %v852_v1, %v1714_v24 }
0x1185   :  { %1431 = vtanh.f32 %v854_v3  ;;  %v1104_v5 = vmul.f32 -1.442695, %v854_v3 }
0x1187   :  { %1433 = vpow2.f32 %v1104_v5 }
0x118f   :  { %v1432_v4 = vpop.eup %1431 }
0x1190   :  { %867 = vrot.lane.b32.xlu0 %v1432_v4, %s1474_s25 }
0x1191   :  { %v1434_v6 = vpop.eup %1433 }
0x1192   :  { %v858_v9 = vadd.f32 1.0, %v1434_v6 }
0x1194   :  { %1435 = vrcp.f32 %v858_v9 }
0x119e   :  { %v1436_v10 = vpop.eup %1435 }
0x119f   :  { %v865_v13 = vmul.f32 %v1436_v10, %v863_v8 }
0x1202   :  { %v868_v11 = vpop.permute.xlu0 %867 }
0x1203   :  { %v870_v12 = vmul.f32 %v1436_v10, %v868_v11 }
0x1205   :  { %872 = vrot.lane.b32.xlu1 %v870_v12, %s1475_s3 }
0x1277   :  { %v873_v14 = vpop.permute.xlu1 %872 }
0x1278   :  { %v875_v0 = vadd.f32 %v873_v14, %v865_v13 }
0x127a   :  { %1437 = vtanh.f32 %v875_v0  ;;  %v970_v33 = vrot.slane %v875_v0, 6 }
0x1284   :  { %v1438_v15 = vpop.eup %1437 }
0x1285   :  { %878 = vrot.lane.b32.xlu0 %v1438_v15, %s1474_s25 }
0x12f7   :  { %v879_v16 = vpop.permute.xlu0 %878 }
0x12f8   :  { %v881_v17 = vmul.f32 %v1436_v10, %v879_v16 }
0x12fa   :  { %v883_v18 = vrot.slane %v881_v17, 4 }
0x12fc   :  { %884 = vrot.lane.b32.xlu1 %v883_v18, %s1475_s3 }
0x136e   :  { %v885_v19 = vpop.permute.xlu1 %884 }
0x136f   :  { %1278 = vmatmul.mubr.msk.f32.vlgmr.msra.gmra.mrb[10].mxu1 %vm146_vm1, %v885_v19 }
0x1442   :  { %v954_v20 = vpop.f32.mrb[10].mxu1 }
0x1443   :  { %v959_v21 = vrot.slane %v954_v20, 2  ;;  %v1279_v22 = vpop.f32.mrb[11].mxu1 }
0x1445   :  { %v961_v23 = vadd.f32 %v959_v21, %v1714_v24  ;;  %v989_v24 = vld [vmem:[%s1779_s4] sm:$0xff]  ;;  %s1476_s4 = smov [#allocation2]  }
0x1446   :  { %v1372_v38 = vpack.c.bf16 %v990_v36, %v989_v24  ;;  %s1083_s14 = sshll.u32 %s1476_s4, 4  ;;  %s1084_s14 = int_to_ptr.vmem [resolvable:$true] %s1083_s14 }
0x1447   :  { %1439 = vtanh.f32 %v961_v23  ;;  %v1106_v26 = vmul.f32 -1.442695, %v961_v23  ;;  %s1447_s15 = scalar_lea.vmem %s1084_s14, 32  ;;  %p1452_p1 = scmp.lt.s32.totalorder %s1084_s14, %s1084_s14 }
0x1448   :  { %1373 = vmatpush3.bf16.msra.mxu0 %v1372_v38  ;;  %p1448_p0 = scmp.ne.s32.totalorder %s1084_s14, %s1447_s15  ;;  %p1453_p2 = scmp.lt.s32.totalorder %s1447_s15, %s1447_s15 }
0x1449   :  { %1441 = vpow2.f32 %v1106_v26  ;;  %1374 = vmatprep.subr.bf16.mxu0 %v1471_v7 }
0x144a   :  { %p1454_p3 = por %p1453_p2, %p1452_p1 }
0x144c   :  { %1376 = vmatpush3.bf16.msra.mxu0 %v1375_v41  ;;  %p1455_p4 = pnand %p1454_p3, %p1448_p0 }
0x1451   :  { %v1440_v25 = vpop.eup %1439 }
0x1452   :  { %974 = vrot.lane.b32.xlu0 %v1440_v25, %s1474_s25 }
0x1453   :  { %v1442_v27 = vpop.eup %1441 }
0x1454   :  { %v965_v28 = vadd.f32 1.0, %v1442_v27 }
0x1456   :  { %1443 = vrcp.f32 %v965_v28 }
0x1460   :  { %v1444_v29 = vpop.eup %1443 }
0x1461   :  { %v972_v34 = vmul.f32 %v1444_v29, %v970_v33 }
0x14c4   :  { %v975_v30 = vpop.permute.xlu0 %974 }
0x14c5   :  { %v977_v32 = vmul.f32 %v1444_v29, %v975_v30 }
0x14c7   :  { %979 = vrot.lane.b32.xlu1 %v977_v32, %s1475_s3 }
0x1539   :  { %v980_v35 = vpop.permute.xlu1 %979 }
0x153a   :  { %v982_v61 = vadd.f32 %v980_v35, %v972_v34 }
0x153c   :  { %1445 = vtanh.f32 %v982_v61 }
0x1546   :  { %v1446_v42 = vpop.eup %1445 }
0x1547   :  { %985 = vrot.lane.b32.xlu0 %v1446_v42, %s1474_s25 }
0x15b9   :  { %v986_v43 = vpop.permute.xlu0 %985 }
0x15ba   :  { %v988_v44 = vmul.f32 %v1444_v29, %v986_v43 }
0x15bc   :  { %v1001_v45 = vrot.slane %v988_v44, 6 }
0x15be   :  { %1002 = vrot.lane.b32.xlu1 %v1001_v45, %s1475_s3 }
0x1630   :  { %v1003_v46 = vpop.permute.xlu1 %1002 }
0x1631   :  { %1289 = vmatmul.mubr.msk.f32.vlgmr.msra.gmra.mrb[8].mxu0 %vm146_vm1, %v1003_v46 }
0x1704   :  { %v1072_v48 = vpop.f32.mrb[8].mxu0 }
0x1705   :  { %v1073_v7 = vadd.f32 %v1107_v47, %v1072_v48  ;;  %v1290_v49 = vpop.f32.mrb[9].mxu0 }
0x1707   :  { %1076 = vst [vmem:[#allocation2] sm:$0x3] %v1073_v7 }
0x1708   :  { %1458 = shalt.err (!%p1455_p4)
}
0x1709   :  { %s1459_s18 = scalar_lea.hbm %s1781_s6, 32 }
0x170a   :  { %p1460_p5 = scmp.ne.s32.totalorder %s1781_s6, %s1459_s18  ;;  %p1463_p6 = scmp.lt.u32.totalorder %s1459_s18, %s1781_s6 }
0x170c   :  { %p1465_p7 = pnand %p1463_p6, %p1460_p5 }
0x170e   :  { %1468 = shalt.err (!%p1465_p7)
}
0x170f   :  { %1086 = dma.vmem_to_hbm [thread:$0]  %s1084_s14, 32, %s1781_s6, [#allocation3]  }
0x1710   :  { %1469 = dma.done.wait [#allocation3], 32  }
0x1711   :  { %1470 = vsyncadd [#allocation3], 4294967264 }
0x1712   :  { %1090 = vsyncpa [#allocation3], 1 }

</bundles_post_ra>
